<compile_context>
chip_gen: v7x
topology: tpu7x:2x2x1
jax: 0.10.0
libtpu: 0.0.40
codegen_flags: <defaults>
</compile_context>

<pallas_src>
import jax
import jax.numpy as jnp
from jax import lax
from jax.experimental import pallas as pl
from jax.experimental.pallas import tpu as pltpu

HIDDEN = 128
BATCH_TILE = 2048  # batch rows (lanes) per grid step; sweep 1024/2048/4096


def value_net_kernel(x_ref, w1_ref, b1_ref, w2_ref, b2_ref, w3_ref, b3_ref,
                     oT_ref):
    """One batch tile.

    x_ref is (tb, in_dim) in its natural layout; everything downstream is
    feature-major (features on sublanes, batch on the 128-lane axis), so the
    bias adds broadcast along lanes and the (out_dim, tb) store is lane-dense.
    """
    x_bf = x_ref[...].astype(jnp.bfloat16)                       # (tb, in)

    # fc1: contract the feature axis of both operands (NT matmul):
    #   (hidden, in) . (tb, in) -> (hidden, tb).  K = in_dim is tiny, so this
    #   is a degenerate, negligible-FLOP MXU op; bf16 operands, f32 acc.
    a1 = lax.dot_general(w1_ref[...], x_bf,
                         dimension_numbers=(((1,), (1,)), ((), ())),
                         preferred_element_type=jnp.float32)
    h1 = jnp.tanh(a1 + b1_ref[...]).astype(jnp.bfloat16)         # (128, tb)

    # fc2: dominant 128x128 matmul; bf16 operands, f32 accumulation on the MXU.
    a2 = jnp.dot(w2_ref[...], h1, preferred_element_type=jnp.float32)
    h2 = jnp.tanh(a2 + b2_ref[...]).astype(jnp.bfloat16)         # (128, tb)

    # fc3: (out, hidden) @ (hidden, tb) value head; M = out_dim is tiny.
    out = (jnp.dot(w3_ref[...], h2, preferred_element_type=jnp.float32)
           + b3_ref[...])                                        # (out, tb)
    oT_ref[...] = out.astype(oT_ref.dtype)


def _round_up(a, m):
    return ((a + m - 1) // m) * m


def _choose_tile(B):
    b128 = _round_up(B, 128)
    tb = min(BATCH_TILE, b128)
    # v7x megacore: keep >= 2 grid steps when the batch allows it so the
    # "parallel" batch axis can actually be sharded across both TensorCores.
    if b128 >= 256 and b128 // tb < 2:
        tb = max(128, ((b128 // 2) // 128) * 128)
    return tb


@jax.jit
def value_net_forward(x, params):
    """x: (B, input_dim) f32 or bf16.  params from prepare_params() (PyTorch layout).

    Returns (B, output_dim) float32, matching value_net.forward.
    """
    w1, b1 = params["w1"], params["b1"]      # (128, in)  bf16, (128, 1) f32
    w2, b2 = params["w2"], params["b2"]      # (128, 128) bf16, (128, 1) f32
    w3, b3 = params["w3"], params["b3"]      # (out, 128) bf16, (out, 1) f32

    B, in_dim = x.shape
    hidden = w1.shape[0]
    out_dim = w3.shape[0]

    tb = _choose_tile(B)
    b_pad = _round_up(B, tb)
    grid = (b_pad // tb,)

    # x stays in its natural (B, in_dim) layout -- no transpose round-trip.
    # Zero-pad the batch tail only when B is not tile-aligned (padded rows are
    # zeros, affect only their own discarded columns, and are sliced off below).
    if b_pad != B:
        x = jnp.pad(x, ((0, b_pad - B), (0, 0)))

    const = lambda shape: pl.BlockSpec(shape, lambda i: (0, 0))

    itemsize = lambda a: jnp.dtype(a.dtype).itemsize
    bytes_w = sum(int(a.size) * itemsize(a) for a in (w1, b1, w2, b2, w3, b3))
    cost = pl.CostEstimate(
        flops=2 * b_pad * (in_dim * hidden + hidden * hidden + hidden * out_dim),
        transcendentals=2 * b_pad * hidden,
        bytes_accessed=int(b_pad * in_dim * itemsize(x)) + bytes_w
        + int(b_pad * out_dim * 4),
    )

    outT = pl.pallas_call(
        value_net_kernel,
        out_shape=jax.ShapeDtypeStruct((out_dim, b_pad), jnp.float32),
        grid=grid,
        in_specs=[
            pl.BlockSpec((tb, in_dim), lambda i: (i, 0)),    # x tile (streamed)
            const((hidden, in_dim)), const((hidden, 1)),     # fc1 (VMEM-resident)
            const((hidden, hidden)), const((hidden, 1)),     # fc2 (VMEM-resident)
            const((out_dim, hidden)), const((out_dim, 1)),   # fc3 (VMEM-resident)
        ],
        out_specs=pl.BlockSpec((out_dim, tb), lambda i: (0, i)),
        compiler_params=pltpu.CompilerParams(
            dimension_semantics=("parallel",),   # shard batch across TCs (v7x)
            vmem_limit_bytes=32 << 20,           # sized for TB up to 4096
        ),
        cost_estimate=cost,
    )(x, w1, b1, w2, b2, w3, b3)

    return outT[:, :B].T                                      # (B, out_dim) f32


def init_params(key, input_dim, output_dim, hidden=HIDDEN):
    """PyTorch nn.Linear-style init; weights kept in PyTorch (out, in) layout."""
    ks = jax.random.split(key, 6)

    def linear(kw, kb, fan_in, fan_out):
        bound = 1.0 / jnp.sqrt(jnp.float32(fan_in))
        w = jax.random.uniform(kw, (fan_out, fan_in), jnp.float32, -bound, bound)
        b = jax.random.uniform(kb, (fan_out, 1), jnp.float32, -bound, bound)
        return w, b

    w1, b1 = linear(ks[0], ks[1], input_dim, hidden)
    w2, b2 = linear(ks[2], ks[3], hidden, hidden)
    w3, b3 = linear(ks[4], ks[5], hidden, output_dim)
    return {"w1": w1, "b1": b1, "w2": w2, "b2": b2, "w3": w3, "b3": b3}


def prepare_params(params_f32):
    """Cast all weights to bf16 (explicit MXU operands, f32 accumulation)."""
    p = dict(params_f32)
    for k in ("w1", "w2", "w3"):
        p[k] = p[k].astype(jnp.bfloat16)
    return p


def value_net_ref(x, p):
    """Pure-JAX f32 reference (PyTorch (out, in) weight layout)."""
    h1 = jnp.tanh(x @ p["w1"].T + p["b1"].T)
    h2 = jnp.tanh(h1 @ p["w2"].T + p["b2"].T)
    return h2 @ p["w3"].T + p["b3"].T


def value_net_ref_kernel_numerics(x, p):
    """Reference mimicking the kernel's bf16-operand / f32-accumulation path."""
    bf, f32 = jnp.bfloat16, jnp.float32
    xb = x.astype(bf)
    w1, w2, w3 = (p[k].astype(bf) for k in ("w1", "w2", "w3"))
    h1 = jnp.tanh(jnp.dot(xb, w1.T, preferred_element_type=f32)
                  + p["b1"].T).astype(bf)
    h2 = jnp.tanh(jnp.dot(h1, w2.T, preferred_element_type=f32)
                  + p["b2"].T).astype(bf)
    return jnp.dot(h2, w3.T, preferred_element_type=f32) + p["b3"].T


if __name__ == "__main__":
    key = jax.random.PRNGKey(0)
    k_x, k_x2, k_p = jax.random.split(key, 3)

    input_dim = 8     # small continuous-control state dim
    output_dim = 1    # value head

    params_f32 = init_params(k_p, input_dim, output_dim)
    params = prepare_params(params_f32)

    # Small batch: single grid step, padded to one 128-row tile.
    x = jax.random.normal(k_x, (8, input_dim), jnp.float32)
    out = jax.block_until_ready(value_net_forward(x, params))
    assert out.shape == (8, output_dim), out.shape
    assert jnp.allclose(out, value_net_ref_kernel_numerics(x, params_f32),
                        atol=1e-2, rtol=1e-2)
    assert jnp.allclose(out, value_net_ref(x, params_f32),
                        atol=5e-2, rtol=5e-2)

    # Larger, non-tile-aligned batch: multi-step grid (megacore path) + padded tail.
    x2 = jax.random.normal(k_x2, (300, input_dim), jnp.float32)
    out2 = jax.block_until_ready(value_net_forward(x2, params))
    assert out2.shape == (300, output_dim), out2.shape
    assert jnp.allclose(out2, value_net_ref_kernel_numerics(x2, params_f32),
                        atol=1e-2, rtol=1e-2)
    assert jnp.allclose(out2, value_net_ref(x2, params_f32),
                        atol=5e-2, rtol=5e-2)

    print("KERNEL_OK")
</pallas_src>

<mosaic_0001>
module attributes {stable_mosaic.version = 11 : i64} {
  func.func @value_net_kernel(%arg0: i32, %arg1: memref<128x8xf32, #tpu.memory_space<vmem>>, %arg2: memref<128x8xbf16, #tpu.memory_space<vmem>>, %arg3: memref<128x1xf32, #tpu.memory_space<vmem>>, %arg4: memref<128x128xbf16, #tpu.memory_space<vmem>>, %arg5: memref<128x1xf32, #tpu.memory_space<vmem>>, %arg6: memref<1x128xbf16, #tpu.memory_space<vmem>>, %arg7: memref<1x1xf32, #tpu.memory_space<vmem>>, %arg8: memref<1x128xf32, #tpu.memory_space<vmem>>) attributes {dimension_semantics = [#tpu.dimension_semantics<parallel>], iteration_bounds = array<i64: 1>, scalar_prefetch = 0 : i64, scratch_operands = 0 : i64, tpu.core_type = #tpu.core_type<tc>, window_params = [{transform_indices = @transform_0, window_bounds = array<i64: 128, 8>}, {pipeline_mode = #tpu.pipeline_mode<synchronous>, transform_indices = @transform_1, window_bounds = array<i64: 128, 8>}, {pipeline_mode = #tpu.pipeline_mode<synchronous>, transform_indices = @transform_2, window_bounds = array<i64: 128, 1>}, {pipeline_mode = #tpu.pipeline_mode<synchronous>, transform_indices = @transform_3, window_bounds = array<i64: 128, 128>}, {pipeline_mode = #tpu.pipeline_mode<synchronous>, transform_indices = @transform_4, window_bounds = array<i64: 128, 1>}, {pipeline_mode = #tpu.pipeline_mode<synchronous>, transform_indices = @transform_5, window_bounds = array<i64: 1, 128>}, {pipeline_mode = #tpu.pipeline_mode<synchronous>, transform_indices = @transform_6, window_bounds = array<i64: 1, 1>}, {transform_indices = @transform_7, window_bounds = array<i64: 1, 128>}]} {
    %c0 = arith.constant 0 : index
    %c0_0 = arith.constant 0 : index
    %0 = vector.load %arg1[%c0, %c0_0] : memref<128x8xf32, #tpu.memory_space<vmem>>, vector<128x8xf32>
    %1 = arith.truncf %0 : vector<128x8xf32> to vector<128x8xbf16>
    %c0_1 = arith.constant 0 : index
    %c0_2 = arith.constant 0 : index
    %2 = vector.load %arg2[%c0_1, %c0_2] : memref<128x8xbf16, #tpu.memory_space<vmem>>, vector<128x8xbf16>
    %cst = arith.constant dense<0.000000e+00> : vector<128x128xf32>
    %3 = tpu.matmul %2, %1, %cst {dimension_numbers = #tpu.dot_dimension_numbers<[1], [1], [0], [0], [0, 0, 1, 0], [], []>} : vector<128x8xbf16>, vector<128x8xbf16>, vector<128x128xf32> -> vector<128x128xf32>
    %c0_3 = arith.constant 0 : index
    %c0_4 = arith.constant 0 : index
    %4 = vector.load %arg3[%c0_3, %c0_4] : memref<128x1xf32, #tpu.memory_space<vmem>>, vector<128x1xf32>
    %5 = vector.broadcast %4 : vector<128x1xf32> to vector<128x128xf32>
    %6 = arith.addf %3, %5 : vector<128x128xf32>
    %7 = math.tanh %6 : vector<128x128xf32>
    %8 = arith.truncf %7 : vector<128x128xf32> to vector<128x128xbf16>
    %c0_5 = arith.constant 0 : index
    %c0_6 = arith.constant 0 : index
    %9 = vector.load %arg4[%c0_5, %c0_6] : memref<128x128xbf16, #tpu.memory_space<vmem>>, vector<128x128xbf16>
    %cst_7 = arith.constant dense<0.000000e+00> : vector<128x128xf32>
    %10 = tpu.matmul %9, %8, %cst_7 {dimension_numbers = #tpu.dot_dimension_numbers<[1], [0], [0], [1], [0, 0, 1, 1], [], []>} : vector<128x128xbf16>, vector<128x128xbf16>, vector<128x128xf32> -> vector<128x128xf32>
    %c0_8 = arith.constant 0 : index
    %c0_9 = arith.constant 0 : index
    %11 = vector.load %arg5[%c0_8, %c0_9] : memref<128x1xf32, #tpu.memory_space<vmem>>, vector<128x1xf32>
    %12 = vector.broadcast %11 : vector<128x1xf32> to vector<128x128xf32>
    %13 = arith.addf %10, %12 : vector<128x128xf32>
    %14 = math.tanh %13 : vector<128x128xf32>
    %15 = arith.truncf %14 : vector<128x128xf32> to vector<128x128xbf16>
    %c0_10 = arith.constant 0 : index
    %c0_11 = arith.constant 0 : index
    %16 = vector.load %arg6[%c0_10, %c0_11] : memref<1x128xbf16, #tpu.memory_space<vmem>>, vector<1x128xbf16>
    %cst_12 = arith.constant dense<0.000000e+00> : vector<1x128xf32>
    %17 = tpu.matmul %16, %15, %cst_12 {dimension_numbers = #tpu.dot_dimension_numbers<[1], [0], [0], [1], [0, 0, 1, 1], [], []>} : vector<1x128xbf16>, vector<128x128xbf16>, vector<1x128xf32> -> vector<1x128xf32>
    %c0_13 = arith.constant 0 : index
    %c0_14 = arith.constant 0 : index
    %18 = vector.load %arg7[%c0_13, %c0_14] : memref<1x1xf32, #tpu.memory_space<vmem>>, vector<1x1xf32>
    %19 = vector.broadcast %18 : vector<1x1xf32> to vector<1x128xf32>
    %20 = arith.addf %17, %19 : vector<1x128xf32>
    %c0_15 = arith.constant 0 : index
    %c0_16 = arith.constant 0 : index
    %21 = vector.load %arg8[%c0_15, %c0_16] : memref<1x128xf32, #tpu.memory_space<vmem>>, vector<1x128xf32>
    tpu.vector_store %arg8[%c0_15, %c0_16], %20 {strides = array<i32>} : memref<1x128xf32, #tpu.memory_space<vmem>>, vector<1x128xf32>,
    return
  }
  func.func @transform_0(%arg0: i32) -> (i32, i32) {
    %c0_i32 = arith.constant 0 : i32
    %c0_i32_0 = arith.constant 0 : i32
    return %arg0, %c0_i32 : i32, i32
  }
  func.func @transform_1(%arg0: i32) -> (i32, i32) {
    %c0_i32 = arith.constant 0 : i32
    %c0_i32_0 = arith.constant 0 : i32
    %c0_i32_1 = arith.constant 0 : i32
    return %c0_i32, %c0_i32_0 : i32, i32
  }
  func.func @transform_2(%arg0: i32) -> (i32, i32) {
    %c0_i32 = arith.constant 0 : i32
    %c0_i32_0 = arith.constant 0 : i32
    %c0_i32_1 = arith.constant 0 : i32
    return %c0_i32, %c0_i32_0 : i32, i32
  }
  func.func @transform_3(%arg0: i32) -> (i32, i32) {
    %c0_i32 = arith.constant 0 : i32
    %c0_i32_0 = arith.constant 0 : i32
    %c0_i32_1 = arith.constant 0 : i32
    return %c0_i32, %c0_i32_0 : i32, i32
  }
  func.func @transform_4(%arg0: i32) -> (i32, i32) {
    %c0_i32 = arith.constant 0 : i32
    %c0_i32_0 = arith.constant 0 : i32
    %c0_i32_1 = arith.constant 0 : i32
    return %c0_i32, %c0_i32_0 : i32, i32
  }
  func.func @transform_5(%arg0: i32) -> (i32, i32) {
    %c0_i32 = arith.constant 0 : i32
    %c0_i32_0 = arith.constant 0 : i32
    %c0_i32_1 = arith.constant 0 : i32
    return %c0_i32, %c0_i32_0 : i32, i32
  }
  func.func @transform_6(%arg0: i32) -> (i32, i32) {
    %c0_i32 = arith.constant 0 : i32
    %c0_i32_0 = arith.constant 0 : i32
    %c0_i32_1 = arith.constant 0 : i32
    return %c0_i32, %c0_i32_0 : i32, i32
  }
  func.func @transform_7(%arg0: i32) -> (i32, i32) {
    %c0_i32 = arith.constant 0 : i32
    %c0_i32_0 = arith.constant 0 : i32
    return %c0_i32, %arg0 : i32, i32
  }
}

</mosaic_0001>

<bundles_post_ra>
// kernel: value_net_forward.1
= control target key start
LH: loop header
LB: loop body
LE: loop exit
PB: predicated region body
PF: predicated region fallthrough
CT: control target
= control target key end

     0   :  { %vm205_vm0 = vcmask 64512   ;;  %v954_v3 = vmov 0   ;;  %vm956_vm1 = vmmov 0   ;;  %s1231_s0 = inlined_call_operand.vmem [shape: f32[128,8], index: 0, kind: input, shape index: {}]   ;;  %s1232_s6 = inlined_call_operand.<no memory space> [shape: f32[1,1], index: 6, kind: input, shape index: {}]   ;;  %s1233_s1 = inlined_call_operand.vmem [shape: bf16[128,8], index: 1, kind: input, shape index: {}]   ;;  %s1234_s2 = inlined_call_operand.vmem [shape: f32[128,1], index: 2, kind: input, shape index: {}]   ;;  %s1235_s4 = inlined_call_operand.vmem [shape: f32[128,1], index: 4, kind: input, shape index: {}]   ;;  %s1236_s3 = inlined_call_operand.vmem [shape: bf16[128,128], index: 3, kind: input, shape index: {}]   ;;  %s1237_s5 = inlined_call_operand.vmem [shape: bf16[1,128], index: 5, kind: input, shape index: {}]   ;;  %s1238_s7 = inlined_call_operand.vmem [shape: f32[1,128], index: 7, kind: output, shape index: {}]  }
   0x1   :  { %v29_v0 = vld [vmem:[%s1231_s0] sm:$0xff]  ;;  %v30_v1 = vld [vmem:[%s1231_s0 + $0x8] sm:$0xff]  ;;  %v31_v2 = vld [vmem:[%s1231_s0 + $0x10] sm:$0xff]  ;;  %872 = vset.pattern.permute.xlu0 %v954_v3  ;;  %873 = vset.pattern.permute.xlu1 %v954_v3  ;;  %v12_v4 = vstv %s1232_s6 }
   0x2   :  { %v45_v5 = vpack.c.bf16 %v30_v1, %v29_v0  ;;  %v32_v6 = vld [vmem:[%s1231_s0 + $0x18] sm:$0xff]  ;;  %13 = vst [vmem:[#allocation2] sm:$0x1] %v12_v4  ;;  %v33_v9 = vld [vmem:[%s1231_s0 + $0x20] sm:$0xff]  ;;  %v34_v10 = vld [vmem:[%s1231_s0 + $0x28] sm:$0xff] }
   0x3   :  { %v46_v7 = vpack.c.bf16 %v32_v6, %v31_v2  ;;  %v874_v11 = vld [vmem:[%s1233_s1] sm:$0xff]   ;;  %v47_v13 = vpack.c.bf16 %v34_v10, %v33_v9  ;;  %v70_v15 = vld [vmem:[%s1234_s2 + $0x8] sm:$0xff]  ;;  %v35_v16 = vld [vmem:[%s1231_s0 + $0x30] sm:$0xff] }
   0x4   :  { %861 = vmatprep.subr.msk.bf16.mxu0 %vm205_vm0, %v45_v5  ;;  %v231_v8 = vsel %vm205_vm0, %v45_v5, 0  ;;  %793 = vmatprep.mubr.msk.bf16.mxu0 %vm205_vm0, %v874_v11  ;;  %v69_v14 = vld [vmem:[%s1234_s2] sm:$0xff]  ;;  %v36_v17 = vld [vmem:[%s1231_s0 + $0x38] sm:$0xff]  ;;  %v71_v18 = vld [vmem:[%s1234_s2 + $0x10] sm:$0xff] }
   0x5   :  { %778 = vmatpush3.bf16.xpose.msra.mxu0 %v231_v8  ;;  %v234_v12 = vsel %vm205_vm0, %v46_v7, 0  ;;  %87 = vperm.xlu0 %872, %v69_v14   ;;  %v72_v19 = vld [vmem:[%s1234_s2 + $0x18] sm:$0xff]  ;;  %v237_v20 = vsel %vm205_vm0, %v47_v13, 0  ;;  %v48_v21 = vpack.c.bf16 %v36_v17, %v35_v16  ;;  %v73_v22 = vld [vmem:[%s1234_s2 + $0x20] sm:$0xff]  ;;  %v74_v23 = vld [vmem:[%s1234_s2 + $0x28] sm:$0xff] }
   0x6   :  { %862 = vmatprep.subr.msk.bf16.mxu0 %vm205_vm0, %v46_v7  ;;  %97 = vperm.xlu1 %873, %v71_v18   ;;  %v75_v24 = vld [vmem:[%s1234_s2 + $0x30] sm:$0xff]  ;;  %v37_v25 = vld [vmem:[%s1231_s0 + $0x40] sm:$0xff]  ;;  %v38_v26 = vld [vmem:[%s1231_s0 + $0x48] sm:$0xff] }
   0x7   :  { %v76_v27 = vld [vmem:[%s1234_s2 + $0x38] sm:$0xff]  ;;  %v240_v28 = vsel %vm205_vm0, %v48_v21, 0  ;;  %v49_v29 = vpack.c.bf16 %v38_v26, %v37_v25  ;;  %v77_v30 = vld [vmem:[%s1234_s2 + $0x40] sm:$0xff]  ;;  %v78_v31 = vld [vmem:[%s1234_s2 + $0x48] sm:$0xff] }
   0x8   :  { %v79_v32 = vld [vmem:[%s1234_s2 + $0x50] sm:$0xff]  ;;  %v40_v34 = vld [vmem:[%s1231_s0 + $0x58] sm:$0xff]  ;;  %v81_v38 = vld [vmem:[%s1234_s2 + $0x60] sm:$0xff] }
   0x9   :  { %92 = vperm.xlu0 %872, %v70_v15   ;;  %v39_v33 = vld [vmem:[%s1231_s0 + $0x50] sm:$0xff]  ;;  %v80_v35 = vld [vmem:[%s1234_s2 + $0x58] sm:$0xff]  ;;  %v243_v36 = vsel %vm205_vm0, %v49_v29, 0  ;;  %v82_v39 = vld [vmem:[%s1234_s2 + $0x68] sm:$0xff] }
   0xa   :  { %102 = vperm.xlu1 %873, %v72_v19   ;;  %v50_v37 = vpack.c.bf16 %v40_v34, %v39_v33  ;;  %v83_v40 = vld [vmem:[%s1234_s2 + $0x70] sm:$0xff]  ;;  %v41_v41 = vld [vmem:[%s1231_s0 + $0x60] sm:$0xff]  ;;  %v42_v42 = vld [vmem:[%s1231_s0 + $0x68] sm:$0xff] }
   0xb   :  { %v84_v43 = vld [vmem:[%s1234_s2 + $0x78] sm:$0xff]  ;;  %v51_v45 = vpack.c.bf16 %v42_v42, %v41_v41  ;;  %v391_v46 = vld [vmem:[%s1235_s4] sm:$0xff]  ;;  %v392_v47 = vld [vmem:[%s1235_s4 + $0x8] sm:$0xff] }
   0xc   :  { %v246_v44 = vsel %vm205_vm0, %v50_v37, 0  ;;  %v393_v48 = vld [vmem:[%s1235_s4 + $0x10] sm:$0xff]  ;;  %v44_v50 = vld [vmem:[%s1231_s0 + $0x78] sm:$0xff]  ;;  %v395_v54 = vld [vmem:[%s1235_s4 + $0x20] sm:$0xff] }
   0xd   :  { %780 = vmatpush3.bf16.xpose.msra.mxu0 %v234_v12  ;;  %107 = vperm.xlu0 %872, %v73_v22   ;;  %v43_v49 = vld [vmem:[%s1231_s0 + $0x70] sm:$0xff]  ;;  %v394_v51 = vld [vmem:[%s1235_s4 + $0x18] sm:$0xff]  ;;  %v249_v52 = vsel %vm205_vm0, %v51_v45, 0  ;;  %v396_v55 = vld [vmem:[%s1235_s4 + $0x28] sm:$0xff] }
   0xe   :  { %863 = vmatprep.subr.msk.bf16.mxu0 %vm205_vm0, %v47_v13  ;;  %112 = vperm.xlu1 %873, %v74_v23   ;;  %v52_v53 = vpack.c.bf16 %v44_v50, %v43_v49  ;;  %v397_v56 = vld [vmem:[%s1235_s4 + $0x30] sm:$0xff]  ;;  %v398_v57 = vld [vmem:[%s1235_s4 + $0x38] sm:$0xff]  ;;  %v399_v59 = vld [vmem:[%s1235_s4 + $0x40] sm:$0xff] }
   0xf   :  { %v400_v60 = vld [vmem:[%s1235_s4 + $0x48] sm:$0xff]  ;;  %v401_v61 = vld [vmem:[%s1235_s4 + $0x50] sm:$0xff]  ;;  %v402_v0 = vld [vmem:[%s1235_s4 + $0x58] sm:$0xff] }
  0x10   :  { %v252_v58 = vsel %vm205_vm0, %v52_v53, 0  ;;  %v875_v62 = vld [vmem:[%s1233_s1 + $0x8] sm:$0xff]   ;;  %v876_v63 = vld [vmem:[%s1233_s1 + $0x10] sm:$0xff]   ;;  %v403_v1 = vld [vmem:[%s1235_s4 + $0x60] sm:$0xff] }
  0x11   :  { %117 = vperm.xlu0 %872, %v75_v24   ;;  %v404_v2 = vld [vmem:[%s1235_s4 + $0x68] sm:$0xff]  ;;  %v405_v3 = vld [vmem:[%s1235_s4 + $0x70] sm:$0xff]  ;;  %v877_v4 = vld [vmem:[%s1233_s1 + $0x18] sm:$0xff]  }
  0x12   :  { %122 = vperm.xlu1 %873, %v76_v27   ;;  %v878_v5 = vld [vmem:[%s1233_s1 + $0x20] sm:$0xff]   ;;  %v406_v6 = vld [vmem:[%s1235_s4 + $0x78] sm:$0xff]  ;;  %v879_v8 = vld [vmem:[%s1233_s1 + $0x28] sm:$0xff]  }
  0x13   :  { %v657_v7 = vld [vmem:[#allocation2] sm:$0x1]  ;;  %v880_v9 = vld [vmem:[%s1233_s1 + $0x30] sm:$0xff]   ;;  %v881_v10 = vld [vmem:[%s1233_s1 + $0x38] sm:$0xff]  }
  0x14   :  { %v882_v11 = vld [vmem:[%s1236_s3] sm:$0xff]  }
  0x15   :  { %782 = vmatpush3.bf16.xpose.msra.mxu0 %v237_v20  ;;  %127 = vperm.xlu0 %872, %v77_v30  }
  0x16   :  { %864 = vmatprep.subr.msk.bf16.mxu0 %vm205_vm0, %v48_v21  ;;  %132 = vperm.xlu1 %873, %v78_v31  }
  0x17   :  { %825 = vmatprep.mubr.bf16.mxu1 %v882_v11 }
  0x19   :  { %137 = vperm.xlu0 %872, %v79_v32  }
  0x1a   :  { %142 = vperm.xlu1 %873, %v80_v35  }
  0x1d   :  { %784 = vmatpush3.bf16.xpose.msra.mxu0 %v240_v28  ;;  %147 = vperm.xlu0 %872, %v81_v38  }
  0x1e   :  { %865 = vmatprep.subr.msk.bf16.mxu0 %vm205_vm0, %v49_v29  ;;  %152 = vperm.xlu1 %873, %v82_v39  }
  0x21   :  { %157 = vperm.xlu0 %872, %v83_v40  }
  0x22   :  { %162 = vperm.xlu1 %873, %v84_v43  }
  0x25   :  { %786 = vmatpush3.bf16.xpose.msra.mxu0 %v243_v36  ;;  %409 = vperm.xlu0 %872, %v391_v46  }
  0x26   :  { %866 = vmatprep.subr.msk.bf16.mxu0 %vm205_vm0, %v50_v37  ;;  %414 = vperm.xlu1 %873, %v392_v47  }
  0x29   :  { %419 = vperm.xlu0 %872, %v393_v48  }
  0x2a   :  { %424 = vperm.xlu1 %873, %v394_v51  }
  0x2d   :  { %788 = vmatpush3.bf16.xpose.msra.mxu0 %v246_v44  ;;  %429 = vperm.xlu0 %872, %v395_v54  }
  0x2e   :  { %867 = vmatprep.subr.msk.bf16.mxu0 %vm205_vm0, %v51_v45  ;;  %434 = vperm.xlu1 %873, %v396_v55  }
  0x31   :  { %439 = vperm.xlu0 %872, %v397_v56  }
  0x32   :  { %444 = vperm.xlu1 %873, %v398_v57  }
  0x35   :  { %790 = vmatpush3.bf16.xpose.msra.mxu0 %v249_v52  ;;  %449 = vperm.xlu0 %872, %v399_v59  }
  0x36   :  { %868 = vmatprep.subr.msk.bf16.mxu0 %vm205_vm0, %v52_v53  ;;  %454 = vperm.xlu1 %873, %v400_v60  }
  0x39   :  { %459 = vperm.xlu0 %872, %v401_v61  }
  0x3a   :  { %464 = vperm.xlu1 %873, %v402_v0  }
  0x3d   :  { %792 = vmatpush3.bf16.xpose.msra.mxu0 %v252_v58  ;;  %469 = vperm.xlu0 %872, %v403_v1  }
  0x3e   :  { %474 = vperm.xlu1 %873, %v404_v2  }
  0x41   :  { %479 = vperm.xlu0 %872, %v405_v3  }
  0x42   :  { %484 = vperm.xlu1 %873, %v406_v6  }
  0x44   :  { %794 = vmatmul.mubr.msk.bf16.vlgmr.msra.gmra.mrb[0].mxu0 %vm205_vm0, %v875_v62 }
  0x45   :  { %797 = vmatprep.mubr.msk.bf16.mxu0 %vm205_vm0, %v876_v63  ;;  %660 = vperm.xlu0 %872, %v657_v7  }
  0x4c   :  { %798 = vmatmul.mubr.msk.bf16.gmra.mrb[4].mxu0 %vm205_vm0, %v877_v4 }
  0x4d   :  { %801 = vmatprep.mubr.msk.bf16.mxu0 %vm205_vm0, %v878_v5 }
  0x54   :  { %802 = vmatmul.mubr.msk.bf16.gmra.mrb[8].mxu0 %vm205_vm0, %v879_v8 }
  0x55   :  { %805 = vmatprep.mubr.msk.bf16.mxu0 %vm205_vm0, %v880_v9 }
  0x5c   :  { %806 = vmatmul.mubr.msk.bf16.gmra.mrb[12].mxu0 %vm205_vm0, %v881_v10 }
  0x84   :  { %v88_v12 = vpop.permute.xlu0 %87 }
  0x85   :  { %v98_v13 = vpop.permute.xlu1 %97 }
  0x88   :  { %v93_v14 = vpop.permute.xlu0 %92 }
  0x89   :  { %v103_v15 = vpop.permute.xlu1 %102 }
  0x8c   :  { %v108_v16 = vpop.permute.xlu0 %107 }
  0x8d   :  { %v113_v17 = vpop.permute.xlu1 %112 }
  0x90   :  { %v118_v18 = vpop.permute.xlu0 %117 }
  0x91   :  { %v123_v22 = vpop.permute.xlu1 %122 }
  0x94   :  { %v128_v28 = vpop.permute.xlu0 %127 }
  0x95   :  { %v133_v29 = vpop.permute.xlu1 %132 }
  0x98   :  { %v138_v37 = vpop.permute.xlu0 %137 }
  0x99   :  { %v143_v41 = vpop.permute.xlu1 %142 }
  0x9c   :  { %v148_v49 = vpop.permute.xlu0 %147 }
  0x9d   :  { %v153_v54 = vpop.permute.xlu1 %152 }
  0xa0   :  { %v158_v60 = vpop.permute.xlu0 %157 }
  0xa1   :  { %v163_v2 = vpop.permute.xlu1 %162 }
 0x117   :  { %v795_v19 = vpop.f32.mrb[0].mxu0 }
 0x118   :  { %v297_v20 = vadd.f32 %v795_v19, %v98_v13  ;;  %v288_v21 = vpop.f32.mrb[1].mxu0 }
 0x119   :  { %v289_v23 = vadd.f32 %v288_v21, %v88_v12  ;;  %v796_v24 = vpop.f32.mrb[2].mxu0  ;;  %v884_v21 = vld [vmem:[%s1236_s3 + $0x10] sm:$0xff]  }
 0x11a   :  { %890 = vtanh.f32 %v297_v20  ;;  %v300_v25 = vadd.f32 %v796_v24, %v103_v15  ;;  %v291_v26 = vpop.f32.mrb[3].mxu0  ;;  %v883_v20 = vld [vmem:[%s1236_s3 + $0x8] sm:$0xff]  }
 0x11b   :  { %892 = vtanh.f32 %v289_v23  ;;  %v292_v27 = vadd.f32 %v291_v26, %v93_v14  ;;  %v886_v23 = vld [vmem:[%s1236_s3 + $0x20] sm:$0xff]   ;;  %v887_v24 = vld [vmem:[%s1236_s3 + $0x28] sm:$0xff]   ;;  %v889_v26 = vld [vmem:[%s1236_s3 + $0x38] sm:$0xff]  }
 0x11c   :  { %894 = vtanh.f32 %v300_v25  ;;  %v888_v25 = vld [vmem:[%s1236_s3 + $0x30] sm:$0xff]  }
 0x11d   :  { %896 = vtanh.f32 %v292_v27  ;;  %v955_v27 = vmov 0.0  }
 0x11f   :  { %v799_v30 = vpop.f32.mrb[4].mxu0 }
 0x120   :  { %v313_v31 = vadd.f32 %v799_v30, %v118_v18  ;;  %v304_v32 = vpop.f32.mrb[5].mxu0 }
 0x121   :  { %v305_v33 = vadd.f32 %v304_v32, %v108_v16  ;;  %v800_v34 = vpop.f32.mrb[6].mxu0 }
 0x122   :  { %898 = vtanh.f32 %v313_v31  ;;  %v316_v35 = vadd.f32 %v800_v34, %v123_v22  ;;  %v307_v36 = vpop.f32.mrb[7].mxu0  ;;  %v885_v22 = vld [vmem:[%s1236_s3 + $0x18] sm:$0xff]  }
 0x123   :  { %900 = vtanh.f32 %v305_v33  ;;  %v308_v38 = vadd.f32 %v307_v36, %v113_v17 }
 0x124   :  { %v891_v39 = vpop.eup %890  ;;  %902 = vtanh.f32 %v316_v35 }
 0x125   :  { %v893_v40 = vpop.eup %892  ;;  %904 = vtanh.f32 %v308_v38 }
 0x126   :  { %v895_v42 = vpop.eup %894 }
 0x127   :  { %v897_v43 = vpop.eup %896  ;;  %v803_v44 = vpop.f32.mrb[8].mxu0  ;;  %v368_v45 = vpack.c.bf16 %v895_v42, %v891_v39 }
 0x128   :  { %v329_v46 = vadd.f32 %v803_v44, %v138_v37  ;;  %v320_v47 = vpop.f32.mrb[9].mxu0  ;;  %v367_v48 = vpack.c.bf16 %v897_v43, %v893_v40 }
 0x129   :  { %v321_v50 = vadd.f32 %v320_v47, %v128_v28  ;;  %v804_v51 = vpop.f32.mrb[10].mxu0  ;;  %v410_v28 = vpop.permute.xlu0 %409 }
 0x12a   :  { %906 = vtanh.f32 %v329_v46  ;;  %v332_v52 = vadd.f32 %v804_v51, %v143_v41  ;;  %v323_v53 = vpop.f32.mrb[11].mxu0  ;;  %809 = vmatprep.subr.bf16.mxu1 %v367_v48 }
 0x12b   :  { %908 = vtanh.f32 %v321_v50  ;;  %v324_v55 = vadd.f32 %v323_v53, %v133_v29  ;;  %810 = vmatpush3.bf16.msra.mxu1 %v367_v48  ;;  %v415_v29 = vpop.permute.xlu1 %414 }
 0x12c   :  { %v899_v56 = vpop.eup %898  ;;  %910 = vtanh.f32 %v332_v52  ;;  %811 = vmatprep.subr.bf16.mxu1 %v368_v45 }
 0x12d   :  { %v901_v57 = vpop.eup %900  ;;  %912 = vtanh.f32 %v324_v55  ;;  %v420_v30 = vpop.permute.xlu0 %419 }
 0x12e   :  { %v903_v58 = vpop.eup %902 }
 0x12f   :  { %v905_v59 = vpop.eup %904  ;;  %v807_v61 = vpop.f32.mrb[12].mxu0  ;;  %812 = vmatpush3.bf16.msra.mxu1 %v368_v45  ;;  %v370_v62 = vpack.c.bf16 %v903_v58, %v899_v56 }
 0x130   :  { %v345_v63 = vadd.f32 %v807_v61, %v158_v60  ;;  %v336_v0 = vpop.f32.mrb[13].mxu0  ;;  %v369_v1 = vpack.c.bf16 %v905_v59, %v901_v57  ;;  %v425_v31 = vpop.permute.xlu1 %424 }
 0x131   :  { %v337_v3 = vadd.f32 %v336_v0, %v148_v49  ;;  %v808_v4 = vpop.f32.mrb[14].mxu0  ;;  %v430_v32 = vpop.permute.xlu0 %429 }
 0x132   :  { %914 = vtanh.f32 %v345_v63  ;;  %v348_v5 = vadd.f32 %v808_v4, %v163_v2  ;;  %v339_v6 = vpop.f32.mrb[15].mxu0  ;;  %813 = vmatprep.subr.bf16.mxu1 %v369_v1 }
 0x133   :  { %916 = vtanh.f32 %v337_v3  ;;  %v340_v7 = vadd.f32 %v339_v6, %v153_v54  ;;  %814 = vmatpush3.bf16.msra.mxu1 %v369_v1 }
 0x134   :  { %v907_v8 = vpop.eup %906  ;;  %918 = vtanh.f32 %v348_v5  ;;  %815 = vmatprep.subr.bf16.mxu1 %v370_v62  ;;  %v435_v33 = vpop.permute.xlu1 %434 }
 0x135   :  { %v909_v9 = vpop.eup %908  ;;  %920 = vtanh.f32 %v340_v7  ;;  %v440_v34 = vpop.permute.xlu0 %439 }
 0x136   :  { %v911_v10 = vpop.eup %910 }
 0x137   :  { %v913_v11 = vpop.eup %912  ;;  %816 = vmatpush3.bf16.msra.mxu1 %v370_v62  ;;  %v372_v12 = vpack.c.bf16 %v911_v10, %v907_v8 }
 0x138   :  { %v371_v13 = vpack.c.bf16 %v913_v11, %v909_v9  ;;  %v445_v38 = vpop.permute.xlu1 %444 }
 0x139   :  { %v450_v44 = vpop.permute.xlu0 %449 }
 0x13a   :  { %817 = vmatprep.subr.bf16.mxu1 %v371_v13 }
 0x13b   :  { %818 = vmatpush3.bf16.msra.mxu1 %v371_v13 }
 0x13c   :  { %v915_v14 = vpop.eup %914  ;;  %819 = vmatprep.subr.bf16.mxu1 %v372_v12  ;;  %v455_v45 = vpop.permute.xlu1 %454 }
 0x13d   :  { %v917_v15 = vpop.eup %916  ;;  %v460_v53 = vpop.permute.xlu0 %459 }
 0x13e   :  { %v919_v16 = vpop.eup %918 }
 0x13f   :  { %v921_v17 = vpop.eup %920  ;;  %820 = vmatpush3.bf16.msra.mxu1 %v372_v12  ;;  %v374_v18 = vpack.c.bf16 %v919_v16, %v915_v14 }
 0x140   :  { %v373_v19 = vpack.c.bf16 %v921_v17, %v917_v15  ;;  %v465_v57 = vpop.permute.xlu1 %464 }
 0x141   :  { %v470_v1 = vpop.permute.xlu0 %469 }
 0x142   :  { %821 = vmatprep.subr.bf16.mxu1 %v373_v19 }
 0x143   :  { %822 = vmatpush3.bf16.msra.mxu1 %v373_v19 }
 0x144   :  { %823 = vmatprep.subr.bf16.mxu1 %v374_v18  ;;  %v475_v6 = vpop.permute.xlu1 %474 }
 0x145   :  { %v480_v12 = vpop.permute.xlu0 %479 }
 0x147   :  { %824 = vmatpush3.bf16.msra.mxu1 %v374_v18 }
 0x148   :  { %841 = vmatprep.subr.bf16.mxu1 %v955_v27  ;;  %v485_v18 = vpop.permute.xlu1 %484 }
 0x14a   :  { %826 = vmatmul.mubr.bf16.vlgmr.msra.gmra.mrb[0].mxu1 %v883_v20 }
 0x14b   :  { %829 = vmatprep.mubr.bf16.mxu1 %v884_v21 }
 0x152   :  { %830 = vmatmul.mubr.bf16.gmra.mrb[4].mxu1 %v885_v22 }
 0x153   :  { %833 = vmatprep.mubr.bf16.mxu1 %v886_v23 }
 0x15a   :  { %834 = vmatmul.mubr.bf16.gmra.mrb[8].mxu1 %v887_v24 }
 0x15b   :  { %837 = vmatprep.mubr.bf16.mxu1 %v888_v25 }
 0x162   :  { %838 = vmatmul.mubr.bf16.gmra.mrb[12].mxu1 %v889_v26 }
 0x163   :  { %857 = vmatprep.mubr.msk.bf16.mxu1 %vm956_vm1, %v955_v27 }
 0x21d   :  { %v827_v35 = vpop.f32.mrb[0].mxu1 }
 0x21e   :  { %v578_v36 = vadd.f32 %v827_v35, %v420_v30  ;;  %v569_v37 = vpop.f32.mrb[1].mxu1 }
 0x21f   :  { %v570_v39 = vadd.f32 %v569_v37, %v410_v28  ;;  %v828_v40 = vpop.f32.mrb[2].mxu1  ;;  %v656_v37 = vld [vmem:[%s1237_s5] sm:$0x1] }
 0x220   :  { %922 = vtanh.f32 %v578_v36  ;;  %v581_v41 = vadd.f32 %v828_v40, %v425_v31  ;;  %v572_v42 = vpop.f32.mrb[3].mxu1 }
 0x221   :  { %924 = vtanh.f32 %v570_v39  ;;  %v573_v43 = vadd.f32 %v572_v42, %v415_v29 }
 0x222   :  { %926 = vtanh.f32 %v581_v41  ;;  %v661_v41 = vpop.permute.xlu0 %660 }
 0x223   :  { %928 = vtanh.f32 %v573_v43 }
 0x225   :  { %v831_v46 = vpop.f32.mrb[4].mxu1 }
 0x226   :  { %v594_v47 = vadd.f32 %v831_v46, %v440_v34  ;;  %v585_v48 = vpop.f32.mrb[5].mxu1 }
 0x227   :  { %v586_v49 = vadd.f32 %v585_v48, %v430_v32  ;;  %v832_v50 = vpop.f32.mrb[6].mxu1 }
 0x228   :  { %930 = vtanh.f32 %v594_v47  ;;  %v597_v51 = vadd.f32 %v832_v50, %v445_v38  ;;  %v588_v52 = vpop.f32.mrb[7].mxu1  ;;  %v663_v38 = vlaneseq }
 0x229   :  { %932 = vtanh.f32 %v586_v49  ;;  %v589_v54 = vadd.f32 %v588_v52, %v435_v33 }
 0x22a   :  { %v923_v55 = vpop.eup %922  ;;  %934 = vtanh.f32 %v597_v51  ;;  %v664_v39 = vshrl.u32 %v663_v38, 7 }
 0x22b   :  { %v925_v56 = vpop.eup %924  ;;  %936 = vtanh.f32 %v589_v54 }
 0x22c   :  { %v927_v58 = vpop.eup %926  ;;  %v665_v40 = vsub.s32 0, %v664_v39 }
 0x22d   :  { %v929_v59 = vpop.eup %928  ;;  %v835_v60 = vpop.f32.mrb[8].mxu1  ;;  %v649_v61 = vpack.c.bf16 %v927_v58, %v923_v55 }
 0x22e   :  { %v610_v62 = vadd.f32 %v835_v60, %v460_v53  ;;  %v601_v63 = vpop.f32.mrb[9].mxu1  ;;  %v648_v0 = vpack.c.bf16 %v929_v59, %v925_v56  ;;  %v666_v42 = vrot.slane %v661_v41, %v665_v40 }
 0x22f   :  { %v602_v2 = vadd.f32 %v601_v63, %v450_v44  ;;  %v836_v3 = vpop.f32.mrb[10].mxu1 }
 0x230   :  { %938 = vtanh.f32 %v610_v62  ;;  %v613_v4 = vadd.f32 %v836_v3, %v465_v57  ;;  %v604_v5 = vpop.f32.mrb[11].mxu1  ;;  %842 = vmatpush3.bf16.msra.mxu1 %v648_v0 }
 0x231   :  { %940 = vtanh.f32 %v602_v2  ;;  %v605_v7 = vadd.f32 %v604_v5, %v455_v45  ;;  %843 = vmatprep.subr.bf16.mxu1 %v955_v27 }
 0x232   :  { %v931_v8 = vpop.eup %930  ;;  %942 = vtanh.f32 %v613_v4 }
 0x233   :  { %v933_v9 = vpop.eup %932  ;;  %944 = vtanh.f32 %v605_v7 }
 0x234   :  { %v935_v10 = vpop.eup %934  ;;  %844 = vmatpush3.bf16.msra.mxu1 %v649_v61 }
 0x235   :  { %v937_v11 = vpop.eup %936  ;;  %v839_v13 = vpop.f32.mrb[12].mxu1  ;;  %845 = vmatprep.subr.bf16.mxu1 %v955_v27  ;;  %v651_v14 = vpack.c.bf16 %v935_v10, %v931_v8 }
 0x236   :  { %v626_v15 = vadd.f32 %v839_v13, %v480_v12  ;;  %v617_v16 = vpop.f32.mrb[13].mxu1  ;;  %v650_v17 = vpack.c.bf16 %v937_v11, %v933_v9 }
 0x237   :  { %v618_v19 = vadd.f32 %v617_v16, %v470_v1  ;;  %v840_v20 = vpop.f32.mrb[14].mxu1 }
 0x238   :  { %946 = vtanh.f32 %v626_v15  ;;  %v629_v21 = vadd.f32 %v840_v20, %v485_v18  ;;  %v620_v22 = vpop.f32.mrb[15].mxu1  ;;  %846 = vmatpush3.bf16.msra.mxu1 %v650_v17 }
 0x239   :  { %948 = vtanh.f32 %v618_v19  ;;  %v621_v23 = vadd.f32 %v620_v22, %v475_v6  ;;  %847 = vmatprep.subr.bf16.mxu1 %v955_v27 }
 0x23a   :  { %v939_v24 = vpop.eup %938  ;;  %950 = vtanh.f32 %v629_v21 }
 0x23b   :  { %v941_v25 = vpop.eup %940  ;;  %952 = vtanh.f32 %v621_v23 }
 0x23c   :  { %v943_v26 = vpop.eup %942  ;;  %848 = vmatpush3.bf16.msra.mxu1 %v651_v14 }
 0x23d   :  { %v945_v28 = vpop.eup %944  ;;  %849 = vmatprep.subr.bf16.mxu1 %v955_v27  ;;  %v653_v29 = vpack.c.bf16 %v943_v26, %v939_v24 }
 0x23e   :  { %v652_v30 = vpack.c.bf16 %v945_v28, %v941_v25 }
 0x240   :  { %850 = vmatpush3.bf16.msra.mxu1 %v652_v30 }
 0x241   :  { %851 = vmatprep.subr.bf16.mxu1 %v955_v27 }
 0x242   :  { %v947_v31 = vpop.eup %946 }
 0x243   :  { %v949_v32 = vpop.eup %948 }
 0x244   :  { %v951_v33 = vpop.eup %950  ;;  %852 = vmatpush3.bf16.msra.mxu1 %v653_v29 }
 0x245   :  { %v953_v34 = vpop.eup %952  ;;  %853 = vmatprep.subr.bf16.mxu1 %v955_v27  ;;  %v655_v35 = vpack.c.bf16 %v951_v33, %v947_v31 }
 0x246   :  { %v654_v36 = vpack.c.bf16 %v953_v34, %v949_v32 }
 0x248   :  { %854 = vmatpush3.bf16.msra.mxu1 %v654_v36 }
 0x249   :  { %855 = vmatprep.subr.bf16.mxu1 %v955_v27 }
 0x24c   :  { %856 = vmatpush3.bf16.msra.mxu1 %v655_v35 }
 0x24f   :  { %858 = vmatmul.mubr.bf16.vlgmr.msra.gmra.mrb[16].mxu1 %v656_v37 }
 0x322   :  { %v701_v43 = vpop.f32.mrb[16].mxu1 }
 0x323   :  { %v702_v44 = vadd.f32 %v701_v43, %v666_v42  ;;  %v859_v45 = vpop.f32.mrb[17].mxu1 }
 0x324   :  { %v704_v46 = vpop.f32.mrb[18].mxu1 }
 0x325   :  { %707 = vst [vmem:[%s1238_s7] sm:$0x1] %v702_v44  ;;  %v860_v27 = vpop.f32.mrb[19].mxu1 }

</bundles_post_ra>
